<compile_context>
chip_gen: v7x
topology: tpu7x:2x2x1
jax: 0.10.0
libtpu: 0.0.40
codegen_flags: <defaults>
</compile_context>

<pallas_src>
import jax
import jax.numpy as jnp
from jax.experimental import pallas as pl
from jax.experimental.pallas import tpu as pltpu

K3 = 27    # 3x3x3 kernel offsets
KPAD = 32  # offsets padded to a lane/sublane-friendly 32 (extra weight rows = 0)


def proj_kernel(x_ref, wt_ref, p_ref):
    """P tile = X tile @ W^T : (TN, C) @ (C, KPAD) -> (TN, KPAD)."""
    p_ref[...] = jnp.dot(
        x_ref[...], wt_ref[...], preferred_element_type=jnp.float32
    ).astype(p_ref.dtype)


def gate_kernel(g_ref, x_ref, o_ref):
    """conv = rowsum(G); att = sigmoid(conv); out = x * att (channel gate)."""
    conv = jnp.sum(g_ref[...], axis=1, keepdims=True)   # (TN, 1) cross-lane reduce
    att = jax.nn.sigmoid(conv)                           # robust sigmoid (EUP path)
    o_ref[...] = (x_ref[...] * att).astype(o_ref.dtype)  # lane-broadcast gate


def sa_layer_pallas(features_pad, nbr_idx, nbr_valid, weight, *, tile_n=256):
    """features_pad: (N_pad, C) f32, nbr_idx/nbr_valid: (N_pad, 27) i32/bool,
    weight: (27, C) f32 (SubMConv3d(planes, 1, 3, bias=False) flattened)."""
    n_pad, c = features_pad.shape
    tile_n = min(tile_n, n_pad)
    assert n_pad % tile_n == 0 and tile_n % 8 == 0
    grid = (n_pad // tile_n,)

    # Transposed conv weights, 27 offsets zero-padded to KPAD=32.
    # (For v5e one could cast features/w_t to bf16 for higher MXU throughput at
    #  slightly looser tolerance; kept f32 here to match the reference exactly.)
    w_pad = jnp.zeros((KPAD, c), jnp.float32).at[:K3].set(weight.astype(jnp.float32))
    w_t = w_pad.T                                        # (C, KPAD)

    # --- stage 1 (Pallas): P = features @ W^T, row-tiled MXU matmul ----------
    p = pl.pallas_call(
        proj_kernel,
        out_shape=jax.ShapeDtypeStruct((n_pad, KPAD), jnp.float32),
        grid_spec=pltpu.PrefetchScalarGridSpec(
            num_scalar_prefetch=0,
            grid=grid,
            in_specs=[
                pl.BlockSpec((tile_n, c), lambda i: (i, 0)),   # feature row tile
                pl.BlockSpec((c, KPAD), lambda i: (0, 0)),     # small resident W^T
            ],
            out_specs=pl.BlockSpec((tile_n, KPAD), lambda i: (i, 0)),
        ),
        compiler_params=pltpu.CompilerParams(dimension_semantics=("parallel",)),
    )(features_pad, w_t)

    # --- stage 2 (glue): rulebook gather G[n, k] = P[nbr_idx[n, k], k] -------
    # TODO(synk): data-dependent row gather has no robust general in-kernel
    # Pallas TPU equivalent (dynamic_gather is shape-restricted), so it is
    # applied as plain-JAX glue between the two Pallas stages.
    idx_pad = jnp.zeros((n_pad, KPAD), jnp.int32).at[:, :K3].set(nbr_idx)
    valid_pad = jnp.zeros((n_pad, KPAD), jnp.bool_).at[:, :K3].set(nbr_valid)
    g = jnp.where(valid_pad, jnp.take_along_axis(p, idx_pad, axis=0), 0.0)

    # --- stage 3 (Pallas): 27-way sum + sigmoid + channel gate ---------------
    return pl.pallas_call(
        gate_kernel,
        out_shape=jax.ShapeDtypeStruct((n_pad, c), features_pad.dtype),
        grid_spec=pltpu.PrefetchScalarGridSpec(
            num_scalar_prefetch=0,
            grid=grid,
            in_specs=[
                pl.BlockSpec((tile_n, KPAD), lambda i: (i, 0)),  # gathered P
                pl.BlockSpec((tile_n, c), lambda i: (i, 0)),     # own features x
            ],
            out_specs=pl.BlockSpec((tile_n, c), lambda i: (i, 0)),
        ),
        compiler_params=pltpu.CompilerParams(dimension_semantics=("parallel",)),
    )(g, features_pad)


def build_rulebook(coords, n_active, spatial, n_pad):
    """Plain-JAX glue (spconv indice-key equivalent): for every active voxel,
    the feature-table row of each of its 27 neighbors plus a validity mask
    (out-of-bounds / empty neighbor -> invalid; padding rows -> all invalid)."""
    d, h, w = spatial
    dense = jnp.full((d * h * w,), -1, dtype=jnp.int32)
    flat = coords[:, 0] * (h * w) + coords[:, 1] * w + coords[:, 2]
    dense = dense.at[flat].set(jnp.arange(n_active, dtype=jnp.int32))

    offsets = jnp.array(
        [(dz, dy, dx) for dz in (-1, 0, 1) for dy in (-1, 0, 1) for dx in (-1, 0, 1)],
        dtype=jnp.int32,
    )  # (27, 3), raster order

    nc = coords[:, None, :] + offsets[None, :, :]                  # (N, 27, 3)
    in_bounds = jnp.all((nc >= 0) & (nc < jnp.array([d, h, w])), axis=-1)
    nflat = nc[..., 0] * (h * w) + nc[..., 1] * w + nc[..., 2]
    nflat = jnp.clip(nflat, 0, d * h * w - 1)
    nbr = jnp.where(in_bounds, dense[nflat], -1)                   # (N, 27)
    valid = nbr >= 0
    nbr = jnp.where(valid, nbr, 0).astype(jnp.int32)

    idx_full = jnp.zeros((n_pad, K3), jnp.int32).at[:n_active].set(nbr)
    valid_full = jnp.zeros((n_pad, K3), jnp.bool_).at[:n_active].set(valid)
    return idx_full, valid_full


def ref_forward(features_pad, nbr_idx, nbr_valid, weight):
    gathered = features_pad[nbr_idx] * nbr_valid[..., None]        # (N_pad, 27, C)
    conv = jnp.einsum("nkc,kc->n", gathered, weight)[:, None]
    att = jax.nn.sigmoid(conv)
    return features_pad * att


if __name__ == "__main__":
    key = jax.random.PRNGKey(0)
    k_feat, k_w, k_coord = jax.random.split(key, 3)

    planes = 128          # C; multiple of 128 keeps every vreg / store lane-dense
    n_active = 300        # number of active sparse voxels
    n_pad = 512           # padded voxel count (multiple of tile_n)
    spatial = (10, 10, 10)
    tile_n = 256

    # deterministic unique voxel coordinates
    flat_choice = jax.random.permutation(
        k_coord, spatial[0] * spatial[1] * spatial[2]
    )[:n_active]
    coords = jnp.stack(
        [
            flat_choice // (spatial[1] * spatial[2]),
            (flat_choice // spatial[2]) % spatial[1],
            flat_choice % spatial[2],
        ],
        axis=1,
    ).astype(jnp.int32)

    # deterministic features and conv weights (SubMConv3d(planes, 1, 3, bias=False)
    # has 27 * planes scalars, flattened here to (27, C))
    features = jax.random.normal(k_feat, (n_active, planes), dtype=jnp.float32)
    features_pad = jnp.zeros((n_pad, planes), jnp.float32).at[:n_active].set(features)
    weight = 0.05 * jax.random.normal(k_w, (K3, planes), dtype=jnp.float32)

    nbr_idx, nbr_valid = build_rulebook(coords, n_active, spatial, n_pad)

    out = sa_layer_pallas(features_pad, nbr_idx, nbr_valid, weight, tile_n=tile_n)
    out = jax.block_until_ready(out)

    ref = ref_forward(features_pad, nbr_idx, nbr_valid, weight)
    err = jnp.max(jnp.abs(out[:n_active] - ref[:n_active]))
    assert jnp.allclose(out[:n_active], ref[:n_active], atol=2e-5, rtol=2e-5), err
    print("KERNEL_OK")
</pallas_src>

<mosaic_0001>
module attributes {stable_mosaic.version = 11 : i64} {
  func.func @proj_kernel(%arg0: i32, %arg1: memref<256x128xf32, #tpu.memory_space<vmem>>, %arg2: memref<128x32xf32, #tpu.memory_space<vmem>>, %arg3: memref<256x32xf32, #tpu.memory_space<vmem>>) attributes {dimension_semantics = [#tpu.dimension_semantics<parallel>], iteration_bounds = array<i64: 2>, scalar_prefetch = 0 : i64, scratch_operands = 0 : i64, tpu.core_type = #tpu.core_type<tc>, window_params = [{transform_indices = @transform_0, window_bounds = array<i64: 256, 128>}, {pipeline_mode = #tpu.pipeline_mode<synchronous>, transform_indices = @transform_1, window_bounds = array<i64: 128, 32>}, {transform_indices = @transform_2, window_bounds = array<i64: 256, 32>}]} {
    %c0 = arith.constant 0 : index
    %c0_0 = arith.constant 0 : index
    %0 = vector.load %arg1[%c0, %c0_0] : memref<256x128xf32, #tpu.memory_space<vmem>>, vector<256x128xf32>
    %c0_1 = arith.constant 0 : index
    %c0_2 = arith.constant 0 : index
    %1 = vector.load %arg2[%c0_1, %c0_2] : memref<128x32xf32, #tpu.memory_space<vmem>>, vector<128x32xf32>
    %cst = arith.constant dense<0.000000e+00> : vector<256x32xf32>
    %2 = tpu.matmul %0, %1, %cst {dimension_numbers = #tpu.dot_dimension_numbers<[1], [0], [0], [1], [0, 0, 1, 1], [], []>} : vector<256x128xf32>, vector<128x32xf32>, vector<256x32xf32> -> vector<256x32xf32>
    %c0_3 = arith.constant 0 : index
    %c0_4 = arith.constant 0 : index
    %3 = vector.load %arg3[%c0_3, %c0_4] : memref<256x32xf32, #tpu.memory_space<vmem>>, vector<256x32xf32>
    tpu.vector_store %arg3[%c0_3, %c0_4], %2 {strides = array<i32>} : memref<256x32xf32, #tpu.memory_space<vmem>>, vector<256x32xf32>,
    return
  }
  func.func @transform_0(%arg0: i32) -> (i32, i32) {
    %c0_i32 = arith.constant 0 : i32
    %c0_i32_0 = arith.constant 0 : i32
    return %arg0, %c0_i32 : i32, i32
  }
  func.func @transform_1(%arg0: i32) -> (i32, i32) {
    %c0_i32 = arith.constant 0 : i32
    %c0_i32_0 = arith.constant 0 : i32
    %c0_i32_1 = arith.constant 0 : i32
    return %c0_i32, %c0_i32_0 : i32, i32
  }
  func.func @transform_2(%arg0: i32) -> (i32, i32) {
    %c0_i32 = arith.constant 0 : i32
    %c0_i32_0 = arith.constant 0 : i32
    return %arg0, %c0_i32 : i32, i32
  }
}

</mosaic_0001>

<bundles_post_ra>
// kernel: tpu_custom_call.1
= control target key start
LH: loop header
LB: loop body
LE: loop exit
PB: predicated region body
PF: predicated region fallthrough
CT: control target
= control target key end

     0   :  { %7 = vsyncpa [#allocation3], 0  ;;  %s1109_s0 = inlined_call_operand.hbm [shape: f32[512,128], index: 0, kind: input, shape index: {}]   ;;  %s1110_s1 = inlined_call_operand.vmem [shape: f32[128,32], index: 1, kind: input, shape index: {}]   ;;  %s1111_s2 = inlined_call_operand.vmem [shape: f32[512,32], index: 2, kind: output, shape index: {}]  }
   0x1   :  { %9 = vsyncpa [#allocation3 + $0x1], 0  ;;  %s854_s9 = smov 0   ;;  %s856_s10 = smov 0  }
   0x2   :  { %s858_s11 = smov 0   ;;  %s860_s12 = smov 0  }
   0x3 LB: > { %s539_s13 = sadd.s32 4294967295, %s834_s12   ;;  %s874_s14 = sadd.s32 1, %s834_s12   ;;  %s834_s12 = sphi %s860_s12, %s1118_s12   ;;  %s830_s11 = sphi %s858_s11, %s1117_s11   ;;  %s826_s10 = sphi %s856_s10, %s1116_s10   ;;  %s822_s9 = sphi %s854_s9, %s1115_s9  }
   0x4   : > { %s19_s15 = ssub.s32 %s834_s12, %s874_s14  ;;  %s22_s16 = sadd.s32 1, %s830_s11 }
   0x5   : > { %p20_p0 = scmp.eq.s32.totalorder %s19_s15, 0  ;;  %p29_p1 = scmp.ne.s32.totalorder %s830_s11, %s826_s10 }
   0x6   : > { %p30_p2 = scmp.eq.s32.totalorder %s834_s12, 0  ;;  %p35_p3 = scmp.ne.s32.totalorder %s826_s10, %s822_s9 }
   0x7   : > { %s884_s17 = scalar_select %p20_p0, %s830_s11, %s22_s16  }
   0x8   : > { %p31_p4 = por %p30_p2, %p29_p1  ;;  %p36_p5 = scmp.eq.s32.totalorder %s539_s13, 0 }
   0x9   : > { %p735_p6 = scmp.lt.s32.totalorder %s834_s12, 2  ;;  %s109_s19 = sand.u32 1, %s830_s11  }
   0xa   : > { %p889_p7 = por %p36_p5, %p35_p3  ;;  %s543_s20 = sshll.u32 %s109_s19, 8 }
   0xb   : > { %s552_s21 = sshll.u32 %s834_s12, 12  ;;  %s113_s25 = scalar_lea.vmem [#allocation2], %s543_s20 }
   0xc   : > { %s898_s24 = scalar_lea.hbm %s1109_s0, %s552_s21  ;;  %s120_s26 = sshll.u32 %s113_s25, 4  ;;  %s900_s26 = int_to_ptr.vmem [resolvable:$true] %s120_s26 }
   0xd   : > { %p902_p8 = pnand %p735_p6, %p31_p4  ;;  %s907_s28 = scalar_lea.sflag [#allocation3], %s109_s19 }
   0xe   : > { %s770_s29 = scalar_lea.hbm %s898_s24, 4096  ;;  %s775_s4 = scalar_lea.hbm %s1109_s0, 8192 }
   0xf   : > { %p771_p10 = scmp.ne.s32.totalorder %s898_s24, %s770_s29  ;;  %p772_p11 = pneg %p902_p8 }
  0x10   : > { %p776_p0 = scmp.lt.u32.totalorder %s898_s24, %s1109_s0  ;;  %p777_p1 = scmp.lt.u32.totalorder %s775_s4, %s770_s29 }
  0x11   : > { %p773_p12 = pnand %p772_p11, %p771_p10  ;;  %p779_p3 = scmp.lt.u32.totalorder %s770_s29, %s898_s24 }
  0x12   : > { %p778_p2 = por %p777_p1, %p776_p0 }
  0x13   : > { %p774_p13 = pneg %p773_p12 }
  0x14   : > { %p780_p4 = por %p779_p3, %p778_p2 }
  0x16   : > { %p781_p5 = pnand %p780_p4, %p774_p13 }
  0x18   : > { %784 = shalt.err (!%p781_p5)
}
  0x19   : > { %s785_s7 = scalar_lea.vmem %s900_s26, 4096  ;;  %s836_s8 = smov [#allocation2]  }
  0x1a   : > { %p786_p6 = scmp.ne.s32.totalorder %s900_s26, %s785_s7  ;;  %s790_s9 = sshll.u32 %s836_s8, 4  ;;  %s791_s9 = int_to_ptr.vmem [resolvable:$false] %s790_s9 }
  0x1b   : > { %s792_s15 = scalar_lea.vmem %s791_s9, 8192  ;;  %p793_p9 = scmp.lt.s32.totalorder %s900_s26, %s791_s9 }
  0x1c   : > { %p788_p10 = pnand %p786_p6, %p772_p11  ;;  %p794_p0 = scmp.lt.s32.totalorder %s792_s15, %s785_s7 }
  0x1e   : > { %p789_p12 = pneg %p788_p10  ;;  %p795_p1 = por %p794_p0, %p793_p9 }
  0x20   : > { %p796_p2 = pnand %p795_p1, %p789_p12 }
  0x22   : > { %799 = shalt.err (!%p796_p2)
}
  0x23   : > { %s837_s16 = smov 128   ;;  %s838_s19 = smov 8  }
  0x24   : > { %734 = dma.hbm_to_vmem [thread:$0]  (!%p902_p8), %s898_s24, 4096, %s900_s26, %s907_s28, %s837_s16, %s837_s16, %s838_s19  }
  0x25   : > { %p128_p11 = scmp.lt.s32.totalorder %s834_s12, 3  ;;  %p1114_p13 = scmp.ge.s32.totalorder %s834_s12, 1 }
  0x27   : > { %p129_p3 = pnand %p1114_p13, %p128_p11 }
  0x28   : > { %s134_s20 = sand.u32 (!%p129_p3), 1, %s826_s10  }
  0x29   : > { %132 = sbr.rel (%p129_p3) target bundleno = 326 (0x146), region = 28  ;;  %s547_s21 = sshll.u32 (!%p129_p3), %s134_s20, 8 }
  0x2a   : > { %s135_s22 = scalar_lea.sflag (!%p129_p3), [#allocation3], %s134_s20  ;;  %s939_s23 = scalar_lea.vmem (!%p129_p3), [#allocation2], %s547_s21 }
  0x30   : > { %817 = dma.done.wait (%p889_p7), %s135_s22, 4096  }
  0x31   : > { %819 = vsyncadd (%p889_p7), %s135_s22, 4294963200  ;;  %v198_v0 = vld [vmem:[%s1110_s1] sm:$0xff]  ;;  %v199_v1 = vld [vmem:[%s1110_s1 + $0x8] sm:$0xff]  ;;  %s548_s6 = sshll.u32 %s539_s13, 5  ;;  %vm439_vm0 = vcmask 261120  }
  0x32   : > { %v200_v2 = vld [vmem:[%s1110_s1 + $0x10] sm:$0xff]  ;;  %v681_v3 = vpack.c.bf16 %v199_v1, %v198_v0  ;;  %v201_v4 = vld [vmem:[%s1110_s1 + $0x18] sm:$0xff]  ;;  %v202_v6 = vld [vmem:[%s1110_s1 + $0x20] sm:$0xff]  ;;  %p161_p7 = scmp.lt.s32.totalorder %s548_s6, 63 }
  0x33   : > { %v685_v5 = vpack.c.bf16 %v201_v4, %v200_v2  ;;  %v203_v7 = vld [vmem:[%s1110_s1 + $0x28] sm:$0xff]  ;;  %v166_v9 = vld [vmem:[%s939_s23] sm:$0xff]  ;;  %v204_v11 = vld [vmem:[%s1110_s1 + $0x30] sm:$0xff] }
  0x34   : > { %682 = vmatprep.subr.bf16.mxu0 %v681_v3  ;;  %713 = vmatprep.subr.bf16.mxu1 %v681_v3  ;;  %v689_v8 = vpack.c.bf16 %v203_v7, %v202_v6  ;;  %v182_v10 = vld [vmem:[%s939_s23 + $0x80] sm:$0xff]  ;;  %v205_v12 = vld [vmem:[%s1110_s1 + $0x38] sm:$0xff]  ;;  %v207_v15 = vld [vmem:[%s1110_s1 + $0x48] sm:$0xff]  ;;  %s1120_s6 = smov (!%p161_p7, %s548_s6), 63 }
  0x35   : > { %684 = vmatpush3.bf16.msra.mxu0 %v681_v3  ;;  %721 = vmatpush3.bf16.msra.mxu1 %v681_v3  ;;  %v693_v13 = vpack.c.bf16 %v205_v12, %v204_v11  ;;  %v206_v14 = vld [vmem:[%s1110_s1 + $0x40] sm:$0xff]  ;;  %v208_v17 = vld [vmem:[%s1110_s1 + $0x50] sm:$0xff]  ;;  %v209_v18 = vld [vmem:[%s1110_s1 + $0x58] sm:$0xff]  ;;  %s549_s7 = sshll.u32 %s1120_s6, 3 }
  0x36   : > { %686 = vmatprep.subr.bf16.mxu0 %v685_v5  ;;  %714 = vmatprep.subr.bf16.mxu1 %v685_v5  ;;  %v697_v16 = vpack.c.bf16 %v207_v15, %v206_v14  ;;  %v701_v19 = vpack.c.bf16 %v209_v18, %v208_v17  ;;  %v210_v20 = vld [vmem:[%s1110_s1 + $0x60] sm:$0xff]  ;;  %v211_v21 = vld [vmem:[%s1110_s1 + $0x68] sm:$0xff]  ;;  %v212_v23 = vld [vmem:[%s1110_s1 + $0x70] sm:$0xff]  ;;  %s1030_s15 = scalar_lea.vmem %s1111_s2, %s549_s7 }
  0x37   : > { %633 = vmatprep.mubr.f32.mxu0 %v166_v9  ;;  %657 = vmatprep.mubr.f32.mxu1 %v182_v10  ;;  %v705_v22 = vpack.c.bf16 %v211_v21, %v210_v20  ;;  %v213_v24 = vld [vmem:[%s1110_s1 + $0x78] sm:$0xff]  ;;  %v167_v26 = vld [vmem:[%s939_s23 + $0x8] sm:$0xff]  ;;  %v168_v28 = vld [vmem:[%s939_s23 + $0x10] sm:$0xff] }
  0x38   : > { %v709_v25 = vpack.c.bf16 %v213_v24, %v212_v23  ;;  %v183_v27 = vld [vmem:[%s939_s23 + $0x88] sm:$0xff]  ;;  %v184_v29 = vld [vmem:[%s939_s23 + $0x90] sm:$0xff]  ;;  %v169_v30 = vld [vmem:[%s939_s23 + $0x18] sm:$0xff] }
  0x39   : > { %688 = vmatpush3.bf16.msra.mxu0 %v685_v5  ;;  %722 = vmatpush3.bf16.msra.mxu1 %v685_v5  ;;  %v185_v31 = vld [vmem:[%s939_s23 + $0x98] sm:$0xff]  ;;  %v170_v32 = vld [vmem:[%s939_s23 + $0x20] sm:$0xff]  ;;  %v171_v34 = vld [vmem:[%s939_s23 + $0x28] sm:$0xff] }
  0x3a   : > { %690 = vmatprep.subr.bf16.mxu0 %v689_v8  ;;  %715 = vmatprep.subr.bf16.mxu1 %v689_v8  ;;  %v186_v33 = vld [vmem:[%s939_s23 + $0xa0] sm:$0xff]  ;;  %v187_v35 = vld [vmem:[%s939_s23 + $0xa8] sm:$0xff]  ;;  %v172_v36 = vld [vmem:[%s939_s23 + $0x30] sm:$0xff] }
  0x3b   : > { %v188_v37 = vld [vmem:[%s939_s23 + $0xb0] sm:$0xff]  ;;  %v173_v38 = vld [vmem:[%s939_s23 + $0x38] sm:$0xff]  ;;  %v174_v40 = vld [vmem:[%s939_s23 + $0x40] sm:$0xff] }
  0x3c   : > { %v189_v39 = vld [vmem:[%s939_s23 + $0xb8] sm:$0xff]  ;;  %v190_v41 = vld [vmem:[%s939_s23 + $0xc0] sm:$0xff]  ;;  %v175_v42 = vld [vmem:[%s939_s23 + $0x48] sm:$0xff] }
  0x3d   : > { %692 = vmatpush3.bf16.msra.mxu0 %v689_v8  ;;  %723 = vmatpush3.bf16.msra.mxu1 %v689_v8  ;;  %v191_v43 = vld [vmem:[%s939_s23 + $0xc8] sm:$0xff]  ;;  %v176_v44 = vld [vmem:[%s939_s23 + $0x50] sm:$0xff]  ;;  %v177_v46 = vld [vmem:[%s939_s23 + $0x58] sm:$0xff] }
  0x3e   : > { %694 = vmatprep.subr.bf16.mxu0 %v693_v13  ;;  %716 = vmatprep.subr.bf16.mxu1 %v693_v13  ;;  %v192_v45 = vld [vmem:[%s939_s23 + $0xd0] sm:$0xff]  ;;  %v193_v47 = vld [vmem:[%s939_s23 + $0xd8] sm:$0xff]  ;;  %v178_v48 = vld [vmem:[%s939_s23 + $0x60] sm:$0xff] }
  0x3f   : > { %v194_v49 = vld [vmem:[%s939_s23 + $0xe0] sm:$0xff]  ;;  %v179_v50 = vld [vmem:[%s939_s23 + $0x68] sm:$0xff]  ;;  %v180_v52 = vld [vmem:[%s939_s23 + $0x70] sm:$0xff] }
  0x40   : > { %v195_v51 = vld [vmem:[%s939_s23 + $0xe8] sm:$0xff]  ;;  %v196_v53 = vld [vmem:[%s939_s23 + $0xf0] sm:$0xff]  ;;  %v181_v54 = vld [vmem:[%s939_s23 + $0x78] sm:$0xff] }
  0x41   : > { %696 = vmatpush3.bf16.msra.mxu0 %v693_v13  ;;  %724 = vmatpush3.bf16.msra.mxu1 %v693_v13  ;;  %v197_v55 = vld [vmem:[%s939_s23 + $0xf8] sm:$0xff] }
  0x42   : > { %698 = vmatprep.subr.bf16.mxu0 %v697_v16  ;;  %717 = vmatprep.subr.bf16.mxu1 %v697_v16 }
  0x45   : > { %700 = vmatpush3.bf16.msra.mxu0 %v697_v16  ;;  %725 = vmatpush3.bf16.msra.mxu1 %v697_v16 }
  0x46   : > { %702 = vmatprep.subr.bf16.mxu0 %v701_v19  ;;  %718 = vmatprep.subr.bf16.mxu1 %v701_v19 }
  0x49   : > { %704 = vmatpush3.bf16.msra.mxu0 %v701_v19  ;;  %726 = vmatpush3.bf16.msra.mxu1 %v701_v19 }
  0x4a   : > { %706 = vmatprep.subr.bf16.mxu0 %v705_v22  ;;  %719 = vmatprep.subr.bf16.mxu1 %v705_v22 }
  0x4d   : > { %708 = vmatpush3.bf16.msra.mxu0 %v705_v22  ;;  %727 = vmatpush3.bf16.msra.mxu1 %v705_v22 }
  0x4e   : > { %710 = vmatprep.subr.bf16.mxu0 %v709_v25  ;;  %720 = vmatprep.subr.bf16.mxu1 %v709_v25 }
  0x51   : > { %712 = vmatpush3.bf16.msra.mxu0 %v709_v25  ;;  %728 = vmatpush3.bf16.msra.mxu1 %v709_v25 }
  0x54   : > { %634 = vmatmul.mubr.f32.vlgmr.msra.gmra.mrb[0].mxu0 %v167_v26  ;;  %658 = vmatmul.mubr.f32.vlgmr.msra.gmra.mrb[0].mxu1 %v183_v27 }
  0x55   : > { %636 = vmatprep.mubr.f32.mxu0 %v168_v28  ;;  %660 = vmatprep.mubr.f32.mxu1 %v184_v29 }
  0x58   : > { %637 = vmatmul.mubr.f32.gmra.mrb[2].mxu0 %v169_v30  ;;  %661 = vmatmul.mubr.f32.gmra.mrb[2].mxu1 %v185_v31 }
  0x59   : > { %639 = vmatprep.mubr.f32.mxu0 %v170_v32  ;;  %663 = vmatprep.mubr.f32.mxu1 %v186_v33 }
  0x5c   : > { %640 = vmatmul.mubr.f32.gmra.mrb[4].mxu0 %v171_v34  ;;  %664 = vmatmul.mubr.f32.gmra.mrb[4].mxu1 %v187_v35 }
  0x5d   : > { %642 = vmatprep.mubr.f32.mxu0 %v172_v36  ;;  %666 = vmatprep.mubr.f32.mxu1 %v188_v37 }
  0x60   : > { %643 = vmatmul.mubr.f32.gmra.mrb[6].mxu0 %v173_v38  ;;  %667 = vmatmul.mubr.f32.gmra.mrb[6].mxu1 %v189_v39 }
  0x61   : > { %645 = vmatprep.mubr.f32.mxu0 %v174_v40  ;;  %669 = vmatprep.mubr.f32.mxu1 %v190_v41 }
  0x64   : > { %646 = vmatmul.mubr.f32.gmra.mrb[8].mxu0 %v175_v42  ;;  %670 = vmatmul.mubr.f32.gmra.mrb[8].mxu1 %v191_v43 }
  0x65   : > { %648 = vmatprep.mubr.f32.mxu0 %v176_v44  ;;  %672 = vmatprep.mubr.f32.mxu1 %v192_v45 }
  0x68   : > { %649 = vmatmul.mubr.f32.gmra.mrb[10].mxu0 %v177_v46  ;;  %673 = vmatmul.mubr.f32.gmra.mrb[10].mxu1 %v193_v47 }
  0x69   : > { %651 = vmatprep.mubr.f32.mxu0 %v178_v48  ;;  %675 = vmatprep.mubr.f32.mxu1 %v194_v49 }
  0x6c   : > { %652 = vmatmul.mubr.f32.gmra.mrb[12].mxu0 %v179_v50  ;;  %676 = vmatmul.mubr.f32.gmra.mrb[12].mxu1 %v195_v51 }
  0x6d   : > { %654 = vmatprep.mubr.f32.mxu0 %v180_v52  ;;  %678 = vmatprep.mubr.f32.mxu1 %v196_v53 }
  0x70   : > { %655 = vmatmul.mubr.f32.gmra.mrb[14].mxu0 %v181_v54  ;;  %679 = vmatmul.mubr.f32.gmra.mrb[14].mxu1 %v197_v55 }
 0x127   : > { %v635_v56 = vpop.f32.mrb[0].mxu0  ;;  %v659_v57 = vpop.f32.mrb[0].mxu1 }
 0x128   : > { %441 = vst.msk [vmem:[%s1030_s15 + $0x8] sm:$0xff] %vm439_vm0, %v635_v56  ;;  %457 = vst.msk [vmem:[%s1030_s15 + $0x88] sm:$0xff] %vm439_vm0, %v659_v57  ;;  %v280_v58 = vpop.f32.mrb[1].mxu0  ;;  %v360_v59 = vpop.f32.mrb[1].mxu1 }
 0x129   : > { %440 = vst.msk [vmem:[%s1030_s15] sm:$0xff] %vm439_vm0, %v280_v58  ;;  %456 = vst.msk [vmem:[%s1030_s15 + $0x80] sm:$0xff] %vm439_vm0, %v360_v59 }
 0x12b   : > { %v638_v60 = vpop.f32.mrb[2].mxu0  ;;  %v662_v61 = vpop.f32.mrb[2].mxu1 }
 0x12c   : > { %443 = vst.msk [vmem:[%s1030_s15 + $0x18] sm:$0xff] %vm439_vm0, %v638_v60  ;;  %459 = vst.msk [vmem:[%s1030_s15 + $0x98] sm:$0xff] %vm439_vm0, %v662_v61  ;;  %v290_v62 = vpop.f32.mrb[3].mxu0  ;;  %v370_v63 = vpop.f32.mrb[3].mxu1 }
 0x12d   : > { %442 = vst.msk [vmem:[%s1030_s15 + $0x10] sm:$0xff] %vm439_vm0, %v290_v62  ;;  %458 = vst.msk [vmem:[%s1030_s15 + $0x90] sm:$0xff] %vm439_vm0, %v370_v63 }
 0x12f   : > { %v641_v0 = vpop.f32.mrb[4].mxu0  ;;  %v665_v1 = vpop.f32.mrb[4].mxu1 }
 0x130   : > { %445 = vst.msk [vmem:[%s1030_s15 + $0x28] sm:$0xff] %vm439_vm0, %v641_v0  ;;  %461 = vst.msk [vmem:[%s1030_s15 + $0xa8] sm:$0xff] %vm439_vm0, %v665_v1  ;;  %v300_v2 = vpop.f32.mrb[5].mxu0  ;;  %v380_v3 = vpop.f32.mrb[5].mxu1 }
 0x131   : > { %444 = vst.msk [vmem:[%s1030_s15 + $0x20] sm:$0xff] %vm439_vm0, %v300_v2  ;;  %460 = vst.msk [vmem:[%s1030_s15 + $0xa0] sm:$0xff] %vm439_vm0, %v380_v3 }
 0x133   : > { %v644_v4 = vpop.f32.mrb[6].mxu0  ;;  %v668_v5 = vpop.f32.mrb[6].mxu1 }
 0x134   : > { %447 = vst.msk [vmem:[%s1030_s15 + $0x38] sm:$0xff] %vm439_vm0, %v644_v4  ;;  %463 = vst.msk [vmem:[%s1030_s15 + $0xb8] sm:$0xff] %vm439_vm0, %v668_v5  ;;  %v310_v6 = vpop.f32.mrb[7].mxu0  ;;  %v390_v7 = vpop.f32.mrb[7].mxu1 }
 0x135   : > { %446 = vst.msk [vmem:[%s1030_s15 + $0x30] sm:$0xff] %vm439_vm0, %v310_v6  ;;  %462 = vst.msk [vmem:[%s1030_s15 + $0xb0] sm:$0xff] %vm439_vm0, %v390_v7 }
 0x137   : > { %v647_v8 = vpop.f32.mrb[8].mxu0  ;;  %v671_v9 = vpop.f32.mrb[8].mxu1 }
 0x138   : > { %449 = vst.msk [vmem:[%s1030_s15 + $0x48] sm:$0xff] %vm439_vm0, %v647_v8  ;;  %465 = vst.msk [vmem:[%s1030_s15 + $0xc8] sm:$0xff] %vm439_vm0, %v671_v9  ;;  %v320_v10 = vpop.f32.mrb[9].mxu0  ;;  %v400_v11 = vpop.f32.mrb[9].mxu1 }
 0x139   : > { %448 = vst.msk [vmem:[%s1030_s15 + $0x40] sm:$0xff] %vm439_vm0, %v320_v10  ;;  %464 = vst.msk [vmem:[%s1030_s15 + $0xc0] sm:$0xff] %vm439_vm0, %v400_v11 }
 0x13b   : > { %v650_v12 = vpop.f32.mrb[10].mxu0  ;;  %v674_v13 = vpop.f32.mrb[10].mxu1 }
 0x13c   : > { %451 = vst.msk [vmem:[%s1030_s15 + $0x58] sm:$0xff] %vm439_vm0, %v650_v12  ;;  %467 = vst.msk [vmem:[%s1030_s15 + $0xd8] sm:$0xff] %vm439_vm0, %v674_v13  ;;  %v330_v14 = vpop.f32.mrb[11].mxu0  ;;  %v410_v15 = vpop.f32.mrb[11].mxu1 }
 0x13d   : > { %450 = vst.msk [vmem:[%s1030_s15 + $0x50] sm:$0xff] %vm439_vm0, %v330_v14  ;;  %466 = vst.msk [vmem:[%s1030_s15 + $0xd0] sm:$0xff] %vm439_vm0, %v410_v15 }
 0x13f   : > { %v653_v16 = vpop.f32.mrb[12].mxu0  ;;  %v677_v17 = vpop.f32.mrb[12].mxu1 }
 0x140   : > { %453 = vst.msk [vmem:[%s1030_s15 + $0x68] sm:$0xff] %vm439_vm0, %v653_v16  ;;  %469 = vst.msk [vmem:[%s1030_s15 + $0xe8] sm:$0xff] %vm439_vm0, %v677_v17  ;;  %v340_v18 = vpop.f32.mrb[13].mxu0  ;;  %v420_v19 = vpop.f32.mrb[13].mxu1 }
 0x141   : > { %452 = vst.msk [vmem:[%s1030_s15 + $0x60] sm:$0xff] %vm439_vm0, %v340_v18  ;;  %468 = vst.msk [vmem:[%s1030_s15 + $0xe0] sm:$0xff] %vm439_vm0, %v420_v19 }
 0x143   : > { %v656_v20 = vpop.f32.mrb[14].mxu0  ;;  %v680_v21 = vpop.f32.mrb[14].mxu1 }
 0x144   : > { %455 = vst.msk [vmem:[%s1030_s15 + $0x78] sm:$0xff] %vm439_vm0, %v656_v20  ;;  %471 = vst.msk [vmem:[%s1030_s15 + $0xf8] sm:$0xff] %vm439_vm0, %v680_v21  ;;  %v350_v22 = vpop.f32.mrb[15].mxu0  ;;  %v430_v23 = vpop.f32.mrb[15].mxu1 }
 0x145   : > { %454 = vst.msk [vmem:[%s1030_s15 + $0x70] sm:$0xff] %vm439_vm0, %v350_v22  ;;  %470 = vst.msk [vmem:[%s1030_s15 + $0xf0] sm:$0xff] %vm439_vm0, %v430_v23 }
 0x146 PF: > { %p12_p8 = scmp.ge.s32.totalorder %s874_s14, 4   ;;  %s1115_s9 = smov %s826_s10 }
 0x147   : > { %s1116_s10 = smov %s830_s11  ;;  %s1117_s11 = smov %s884_s17 }
 0x148   : > { %s1118_s12 = smov %s874_s14  ;;  %14 = sbr.rel (!%p12_p8) target bundleno = 3 (0x3), region = 68 }
 0x14f   :  { %494 = vsyncpa [#allocation3], 1 }
 0x150   :  { %496 = vsyncpa [#allocation3 + $0x1], 1 }

</bundles_post_ra>
